<compile_context>
chip_gen: v7x
topology: tpu7x:2x2x1
jax: 0.10.0
libtpu: 0.0.40
codegen_flags: <defaults>
</compile_context>

<pallas_src>
import jax
import jax.numpy as jnp
from jax import lax
from jax.experimental import pallas as pl
from jax.experimental.pallas import tpu as pltpu


# ---------------------------------------------------------------------------
# Kernels
# ---------------------------------------------------------------------------

def _point_head_kernel(feat_ref, w1t_ref, b1_ref, w2_ref, b2_ref, p_ref):
    """Point head for one block of Bp batch rows.

    feat_ref : (Bp, W, C) bf16  backbone features, channel-last (lane-dense C)
    w1t_ref  : (C, C)     bf16  centre tap of point_head conv3x3, BN folded, [ci, co]
    b1_ref   : (1, C)     f32   folded bias: b1 * bn_scale + bn_shift
    w2_ref   : (P, C)     f32   point_head conv1x1 weights [po, ci]   (P == 1)
    b2_ref   : (1, P)     f32
    p_ref    : (Bp, P)    f32   per-image point logits
    """
    # F.adaptive_max_pool2d(out, (1, 1)) == global spatial max (H == 1):
    # sublane reduce over W; C stays on the lane axis.  Widen to f32 for the
    # reduce (exact: inputs are already bf16 values), cast back for the MXU.
    m = jnp.max(feat_ref[...].astype(jnp.float32), axis=1).astype(jnp.bfloat16)   # (Bp, C)
    # Conv2d(C, C, 3, padding=1) on a 1x1 map == centre-tap linear; BatchNorm
    # already folded into the weights/bias.  bf16 MXU matmul, f32 accumulation.
    h = jnp.dot(m, w1t_ref[...], preferred_element_type=jnp.float32) + b1_ref[...]
    h = jnp.maximum(h, 0.0)                                                        # ReLU
    # Conv2d(C, num_points=1, kernel_size=1): tiny projection -> VPU mul + lane reduce.
    p_ref[...] = jnp.sum(h * w2_ref[...], axis=1, keepdims=True) + b2_ref[...]


def _conv_out_kernel(xs_ref, ws_ref, b_ref, o_ref):
    """conv_out + ReLU as one MXU matmul per (OC-tile, batch-block) grid cell.

    xs_ref : (KS, Nb)   bf16  im2col stack of the 3 shifted [feat; points] maps
    ws_ref : (OCt, KS)  bf16  matching stacked conv_out weights (kh == 1 row)
    b_ref  : (OCt, 1)   f32
    o_ref  : (OCt, Nb)  f32   lane-dense output tile
    """
    acc = jnp.dot(ws_ref[...], xs_ref[...], preferred_element_type=jnp.float32)
    o_ref[...] = jnp.maximum(acc + b_ref[...], 0.0)


# ---------------------------------------------------------------------------
# Tiling helpers
# ---------------------------------------------------------------------------

def _largest_divisor(n, limit, align):
    """Largest divisor of n that is <= limit and (a multiple of `align` or == n)."""
    best = None
    for d in range(1, n + 1):
        if n % d == 0 and d <= limit and (d % align == 0 or d == n):
            best = d
    if best is None:
        best = 1
        for d in range(1, n + 1):
            if n % d == 0 and d <= limit:
                best = d
    return best


def _pick_block_b(batch, width, target_lanes):
    """Largest divisor of `batch` whose lane extent (bb * width) <= target_lanes."""
    want = max(1, target_lanes // max(width, 1))
    best = 1
    for d in range(1, batch + 1):
        if batch % d == 0 and d <= want:
            best = d
    return best


def _vmem_limit_bytes(footprint, device_kind):
    """Scoped-VMEM limit from the actual tile footprint + headroom, clamped
    below the generation's physical VMEM (64 MiB on v7x, 128 MiB elsewhere)."""
    phys = (64 if "v7" in device_kind else 128) * 1024 * 1024
    want = max(32 * 1024 * 1024, footprint + 8 * 1024 * 1024)
    return int(min(phys - 16 * 1024 * 1024, want))


# ---------------------------------------------------------------------------
# Forward wrapper
# ---------------------------------------------------------------------------

def pointrend_head(feat, params, *, block_b=None, block_oc=None, block_pb=None):
    """feat: (B, C, 1, W) backbone features (NCHW). Returns (B, OC, 1, W)."""
    B, C, H, W = feat.shape
    P = params["ph_w2"].shape[0]
    OC = params["co_w"].shape[0]
    assert H == 1, "torch.cat in PointRend.forward requires feature height == 1"
    assert P == 1, "PointRend.forward is only shape-consistent for num_points == 1"
    assert params["ph_w1"].shape[0] == C and params["co_w"].shape[1] == C + P

    # ---- generation-aware tiling defaults ------------------------------------
    try:
        kind = jax.devices()[0].device_kind.lower()
    except Exception:  # pragma: no cover
        kind = ""
    # v6e / v7x have a 256-wide MXU N dim; v5e (and older) are 128-wide.
    lane_target = 256 if ("v6" in kind or "v7" in kind) else 128

    if block_b is None:
        block_b = _pick_block_b(B, W, lane_target)
    # The conv-output lane dim must be a multiple of 128 (or cover the full
    # B*W extent); fall back to the full batch if the chosen block is not.
    if (block_b * W) % 128 != 0:
        block_b = B
    if block_oc is None:
        # Actually tile OC at real scale so the conv_out weight slice fits the
        # v7x 64 MiB VMEM budget (block_oc * KS * 2B, single-buffered).
        block_oc = _largest_divisor(OC, limit=512, align=lane_target) if OC > 512 else OC
    if block_pb is None:
        # Point-head batch block decoupled from block_b: up to 128 pooled rows
        # per MXU matmul instead of the conv kernel's lane-derived block.
        block_pb = _largest_divisor(B, limit=128, align=min(8, B))

    assert B % block_b == 0 and OC % block_oc == 0 and B % block_pb == 0
    assert block_oc % 8 == 0 or block_oc == OC
    assert block_pb % 8 == 0 or block_pb == B
    Nb = block_b * W

    eps = 1e-5

    # ---- parameter massaging (layout plumbing, plain JAX) ---------------------
    # Fold BatchNorm (inference mode) straight into the centre-tap weights/bias:
    #   relu((m @ W1^T + b1) * s + t)  ==  relu(m @ (W1^T * s) + (b1 * s + t)).
    scale = params["bn_gamma"] / jnp.sqrt(params["bn_var"] + eps)                  # (C,)
    shift = params["bn_beta"] - params["bn_mean"] * scale
    w1t = (params["ph_w1"][:, :, 1, 1].T * scale[None, :]).astype(jnp.bfloat16)    # (C, C) [ci, co]
    b1 = (params["ph_b1"] * scale + shift).reshape(1, C).astype(jnp.float32)
    w2 = params["ph_w2"][:, :, 0, 0].astype(jnp.float32)                            # (P, C)
    b2 = params["ph_b2"].reshape(1, P).astype(jnp.float32)

    # Channel-last bf16 feature copy for the point head: C sits on the lane axis
    # (lane-dense at C=2048) and the HBM read is halved vs f32.
    f = feat.reshape(B, C, W).astype(jnp.float32)
    f_bwc = jnp.transpose(f, (0, 2, 1)).astype(jnp.bfloat16)                        # (B, W, C)

    # ---- kernel 1: batched point head ------------------------------------------
    n_pb = B // block_pb

    def _point_head_call(single_buffer):
        w_bufs = 1 if single_buffer else 2
        footprint = (2 * block_pb * W * C * 2          # feature tile (bf16, double-buffered)
                     + w_bufs * C * C * 2              # folded w1t (bf16)
                     + w_bufs * (2 * C + P * C + P) * 4
                     + 2 * block_pb * P * 4)           # output tile
        vmem = _vmem_limit_bytes(footprint, kind)

        def _const(shape):
            # Constant operands (same block every grid step): single-buffer to
            # halve their VMEM footprint when the runtime supports it.
            if single_buffer:
                return pl.BlockSpec(shape, lambda i: (0,) * len(shape),
                                    pipeline_mode=pl.Buffered(1))
            return pl.BlockSpec(shape, lambda i: (0,) * len(shape))

        return pl.pallas_call(
            _point_head_kernel,
            out_shape=jax.ShapeDtypeStruct((B, P), jnp.float32),
            grid_spec=pltpu.PrefetchScalarGridSpec(
                num_scalar_prefetch=0,
                grid=(n_pb,),
                in_specs=[
                    pl.BlockSpec((block_pb, W, C), lambda i: (i, 0, 0)),   # features (B, W, C)
                    _const((C, C)),                                        # BN-folded w1t
                    _const((1, C)),                                        # folded bias
                    _const((P, C)),                                        # w2
                    _const((1, P)),                                        # b2
                ],
                out_specs=pl.BlockSpec((block_pb, P), lambda i: (i, 0)),
            ),
            compiler_params=pltpu.CompilerParams(
                dimension_semantics=("parallel",),
                vmem_limit_bytes=vmem),
        )(f_bwc, w1t, b1, w2, b2)

    try:
        points = _point_head_call(single_buffer=True)
    except Exception:  # Buffered(1) unsupported on this jax/Mosaic -> default double-buffering
        points = _point_head_call(single_buffer=False)                              # (B, P)

    # ---- wrapper-side im2col for conv_out (layout plumbing) --------------------
    # torch.cat([out, points.expand(..., W)], dim=1) + 3x3 conv on a height-1 map
    # == width-3 1-D conv (only the kh==1 weight row contributes).  Stack the
    # three shifted copies along K so the kernel is one lane-dense MXU matmul
    # with 128-aligned K (zero K-pad rows pair with zero weight columns).
    # TODO(synk): for large-W deployments, feed [feat; points] once and do three
    # per-tap matmuls in-kernel against pl.ds-shifted windows (with batch-boundary
    # masking) to cut this 3x im2col HBM traffic.
    KL = 3 * (C + P)
    KS = ((KL + 127) // 128) * 128
    fT = jnp.transpose(f, (1, 0, 2))                                                 # (C, B, W)
    pB = jnp.broadcast_to(points.T[:, :, None], (P, B, W))                           # (P, B, W)
    x = jnp.concatenate([fT, pB], axis=0)                                            # (C+P, B, W)
    zc = jnp.zeros((C + P, B, 1), jnp.float32)
    x_l = jnp.concatenate([zc, x[:, :, :W - 1]], axis=2)                             # input at w-1
    x_r = jnp.concatenate([x[:, :, 1:], zc], axis=2)                                 # input at w+1
    xs = jnp.concatenate([x_l, x, x_r], axis=0).reshape(KL, B * W)
    xs = jnp.pad(xs, ((0, KS - KL), (0, 0))).astype(jnp.bfloat16)                    # (KS, B*W)

    w_taps = params["co_w"][:, :, 1, :]                                              # (OC, C+P, 3)
    ws = jnp.concatenate(
        [w_taps[:, :, 0], w_taps[:, :, 1], w_taps[:, :, 2]], axis=1)                 # (OC, 3*(C+P))
    ws = jnp.pad(ws, ((0, 0), (0, KS - KL))).astype(jnp.bfloat16)                    # (OC, KS)
    bout = params["co_b"].reshape(OC, 1).astype(jnp.float32)

    # ---- kernel 2: conv_out + ReLU ----------------------------------------------
    n_oc = OC // block_oc
    n_b = B // block_b
    # Truthful advisory cost: xs is re-fetched once per OC tile; ws is read once.
    flops = 2 * OC * KS * B * W
    bytes_accessed = int(ws.size) * 2 + int(xs.size) * 2 * n_oc + OC * B * W * 4 + OC * 4

    def _conv_out_call(single_buffer):
        ws_bufs = 1 if single_buffer else 2
        footprint = (ws_bufs * block_oc * KS * 2       # weight tile (bf16)
                     + 2 * KS * Nb * 2                 # im2col tile (bf16, double-buffered)
                     + 2 * block_oc * Nb * 4           # output tile (f32, double-buffered)
                     + ws_bufs * block_oc * 4)         # bias
        vmem = _vmem_limit_bytes(footprint, kind)
        if single_buffer:
            # Weight/bias change only on the outer (OC) grid axis: single-buffer.
            ws_spec = pl.BlockSpec((block_oc, KS), lambda j, i: (j, 0),
                                   pipeline_mode=pl.Buffered(1))
            b_spec = pl.BlockSpec((block_oc, 1), lambda j, i: (j, 0),
                                  pipeline_mode=pl.Buffered(1))
        else:
            ws_spec = pl.BlockSpec((block_oc, KS), lambda j, i: (j, 0))
            b_spec = pl.BlockSpec((block_oc, 1), lambda j, i: (j, 0))
        return pl.pallas_call(
            _conv_out_kernel,
            out_shape=jax.ShapeDtypeStruct((OC, B * W), jnp.float32),
            grid_spec=pltpu.PrefetchScalarGridSpec(
                num_scalar_prefetch=0,
                # oc outer so the weight slice stays resident across batch blocks;
                # both axes parallel so v7x's 2 TensorCores each get whole OC tiles.
                grid=(n_oc, n_b),
                in_specs=[
                    pl.BlockSpec((KS, Nb), lambda j, i: (0, i)),        # im2col stack
                    ws_spec,                                            # stacked weights
                    b_spec,                                             # bias
                ],
                out_specs=pl.BlockSpec((block_oc, Nb), lambda j, i: (j, i)),
            ),
            compiler_params=pltpu.CompilerParams(
                dimension_semantics=("parallel", "parallel"),
                vmem_limit_bytes=vmem),
            cost_estimate=pl.CostEstimate(flops=flops, transcendentals=0,
                                          bytes_accessed=bytes_accessed),
        )(xs, ws, bout)

    try:
        out2d = _conv_out_call(single_buffer=True)
    except Exception:  # Buffered(1) unsupported -> default double-buffering
        out2d = _conv_out_call(single_buffer=False)                                 # (OC, B*W)

    # (OC, B*W) -> NCHW.  (A transposed (Nb, OCt) kernel output would avoid this
    # XLA transpose, but only if the consumer accepted a (B, W, OC) layout.)
    out = out2d.reshape(OC, B, W).transpose(1, 0, 2)                                 # (B, OC, W)
    return out.reshape(B, OC, 1, W)


# ---------------------------------------------------------------------------
# Pure-JAX reference (mirrors the torch forward, post-backbone, inference BN)
# ---------------------------------------------------------------------------

def pointrend_head_reference(feat, params):
    B, C, H, W = feat.shape
    eps = 1e-5
    pooled = jnp.max(feat, axis=(2, 3))                                             # adaptive_max_pool2d -> (1,1)
    h = pooled @ params["ph_w1"][:, :, 1, 1].T + params["ph_b1"]                    # conv3x3 on 1x1 map
    h = (h - params["bn_mean"]) / jnp.sqrt(params["bn_var"] + eps) * params["bn_gamma"] + params["bn_beta"]
    h = jnp.maximum(h, 0.0)
    p = h @ params["ph_w2"][:, :, 0, 0].T + params["ph_b2"]                          # (B, P)
    pb = jnp.broadcast_to(p[:, :, None, None], (B, p.shape[1], 1, W))
    xcat = jnp.concatenate([feat, pb], axis=1)                                       # (B, C+P, 1, W)
    out = lax.conv_general_dilated(
        xcat, params["co_w"], window_strides=(1, 1), padding=((1, 1), (1, 1)),
        dimension_numbers=("NCHW", "OIHW", "NCHW"),
        precision=lax.Precision.HIGHEST)
    out = out + params["co_b"][None, :, None, None]
    return jnp.maximum(out, 0.0)


if __name__ == "__main__":
    B = 16         # 16 images; B*W = 256 keeps the conv output tile lane-dense
    C = 8          # stand-in for the 2048-channel resnet50 feature map
    P = 1          # num_points (the torch forward only type-checks for 1)
    OC = C         # out_channels must equal backbone channels (point_head conv1 input)
    W = 16         # feature-map width; height is 1 (required by torch.cat)

    key = jax.random.PRNGKey(0)
    k = jax.random.split(key, 9)
    params = {
        "ph_w1": 0.1 * jax.random.normal(k[0], (OC, OC, 3, 3), jnp.float32),
        "ph_b1": 0.1 * jax.random.normal(k[1], (OC,), jnp.float32),
        "bn_gamma": 1.0 + 0.1 * jax.random.normal(k[2], (OC,), jnp.float32),
        "bn_beta": 0.1 * jax.random.normal(k[3], (OC,), jnp.float32),
        "bn_mean": jnp.zeros((OC,), jnp.float32),
        "bn_var": jnp.ones((OC,), jnp.float32),
        "ph_w2": 0.1 * jax.random.normal(k[4], (P, OC, 1, 1), jnp.float32),
        "ph_b2": 0.1 * jax.random.normal(k[5], (P,), jnp.float32),
        "co_w": 0.1 * jax.random.normal(k[6], (OC, C + P, 3, 3), jnp.float32),
        "co_b": 0.1 * jax.random.normal(k[7], (OC,), jnp.float32),
    }
    feat = jax.random.normal(k[8], (B, C, 1, W), jnp.float32)

    out = pointrend_head(feat, params)
    out = jax.block_until_ready(out)

    ref = pointrend_head_reference(feat, params)
    assert out.shape == ref.shape == (B, OC, 1, W)
    # Tolerance sized for bf16 MXU operands with f32 accumulation.
    if not jnp.allclose(out, ref, rtol=1e-2, atol=1e-2):
        err = jnp.max(jnp.abs(out - ref))
        raise AssertionError(f"Pallas kernel output mismatch vs JAX reference (max abs err {err})")
    print("KERNEL_OK")
</pallas_src>

<mosaic_0001>
module attributes {stable_mosaic.version = 11 : i64} {
  func.func @_point_head_kernel(%arg0: i32, %arg1: memref<16x16x8xbf16, #tpu.memory_space<vmem>>, %arg2: memref<8x8xbf16, #tpu.memory_space<vmem>>, %arg3: memref<1x8xf32, #tpu.memory_space<vmem>>, %arg4: memref<1x8xf32, #tpu.memory_space<vmem>>, %arg5: memref<1x1xf32, #tpu.memory_space<vmem>>, %arg6: memref<16x1xf32, #tpu.memory_space<vmem>>) attributes {dimension_semantics = [#tpu.dimension_semantics<parallel>], iteration_bounds = array<i64: 1>, scalar_prefetch = 0 : i64, scratch_operands = 0 : i64, tpu.core_type = #tpu.core_type<tc>, window_params = [{transform_indices = @transform_0, window_bounds = array<i64: 16, 16, 8>}, {pipeline_mode = #tpu.pipeline_mode<synchronous>, transform_indices = @transform_1, window_bounds = array<i64: 8, 8>}, {pipeline_mode = #tpu.pipeline_mode<synchronous>, transform_indices = @transform_2, window_bounds = array<i64: 1, 8>}, {pipeline_mode = #tpu.pipeline_mode<synchronous>, transform_indices = @transform_3, window_bounds = array<i64: 1, 8>}, {pipeline_mode = #tpu.pipeline_mode<synchronous>, transform_indices = @transform_4, window_bounds = array<i64: 1, 1>}, {transform_indices = @transform_5, window_bounds = array<i64: 16, 1>}]} {
    %c0 = arith.constant 0 : index
    %c0_0 = arith.constant 0 : index
    %c0_1 = arith.constant 0 : index
    %0 = vector.load %arg1[%c0, %c0_0, %c0_1] : memref<16x16x8xbf16, #tpu.memory_space<vmem>>, vector<16x16x8xbf16>
    %1 = arith.extf %0 : vector<16x16x8xbf16> to vector<16x16x8xf32>
    %cst = arith.constant dense<0xFF800000> : vector<16x8xf32>
    %2 = vector.multi_reduction <maximumf>, %1, %cst [1] : vector<16x16x8xf32> to vector<16x8xf32>
    %3 = arith.truncf %2 : vector<16x8xf32> to vector<16x8xbf16>
    %c0_2 = arith.constant 0 : index
    %c0_3 = arith.constant 0 : index
    %4 = vector.load %arg2[%c0_2, %c0_3] : memref<8x8xbf16, #tpu.memory_space<vmem>>, vector<8x8xbf16>
    %cst_4 = arith.constant dense<0.000000e+00> : vector<16x8xf32>
    %5 = tpu.matmul %3, %4, %cst_4 {dimension_numbers = #tpu.dot_dimension_numbers<[1], [0], [0], [1], [0, 0, 1, 1], [], []>} : vector<16x8xbf16>, vector<8x8xbf16>, vector<16x8xf32> -> vector<16x8xf32>
    %c0_5 = arith.constant 0 : index
    %c0_6 = arith.constant 0 : index
    %6 = vector.load %arg3[%c0_5, %c0_6] : memref<1x8xf32, #tpu.memory_space<vmem>>, vector<1x8xf32>
    %7 = vector.broadcast %6 : vector<1x8xf32> to vector<16x8xf32>
    %8 = arith.addf %5, %7 : vector<16x8xf32>
    %cst_7 = arith.constant 0.000000e+00 : f32
    %9 = vector.broadcast %cst_7 : f32 to vector<16x8xf32>
    %10 = arith.maximumf %8, %9 : vector<16x8xf32>
    %c0_8 = arith.constant 0 : index
    %c0_9 = arith.constant 0 : index
    %11 = vector.load %arg4[%c0_8, %c0_9] : memref<1x8xf32, #tpu.memory_space<vmem>>, vector<1x8xf32>
    %12 = vector.broadcast %11 : vector<1x8xf32> to vector<16x8xf32>
    %13 = arith.mulf %10, %12 : vector<16x8xf32>
    %cst_10 = arith.constant dense<0.000000e+00> : vector<16xf32>
    %14 = vector.multi_reduction <add>, %13, %cst_10 [1] : vector<16x8xf32> to vector<16xf32>
    %15 = vector.shape_cast %14 : vector<16xf32> to vector<16x1xf32>
    %c0_11 = arith.constant 0 : index
    %c0_12 = arith.constant 0 : index
    %16 = vector.load %arg5[%c0_11, %c0_12] : memref<1x1xf32, #tpu.memory_space<vmem>>, vector<1x1xf32>
    %17 = vector.broadcast %16 : vector<1x1xf32> to vector<16x1xf32>
    %18 = arith.addf %15, %17 : vector<16x1xf32>
    %c0_13 = arith.constant 0 : index
    %c0_14 = arith.constant 0 : index
    %19 = vector.load %arg6[%c0_13, %c0_14] : memref<16x1xf32, #tpu.memory_space<vmem>>, vector<16x1xf32>
    tpu.vector_store %arg6[%c0_13, %c0_14], %18 {strides = array<i32>} : memref<16x1xf32, #tpu.memory_space<vmem>>, vector<16x1xf32>,
    return
  }
  func.func @transform_0(%arg0: i32) -> (i32, i32, i32) {
    %c0_i32 = arith.constant 0 : i32
    %c0_i32_0 = arith.constant 0 : i32
    %c0_i32_1 = arith.constant 0 : i32
    return %arg0, %c0_i32, %c0_i32_0 : i32, i32, i32
  }
  func.func @transform_1(%arg0: i32) -> (i32, i32) {
    %c0_i32 = arith.constant 0 : i32
    %c0_i32_0 = arith.constant 0 : i32
    %c0_i32_1 = arith.constant 0 : i32
    return %c0_i32, %c0_i32_0 : i32, i32
  }
  func.func @transform_2(%arg0: i32) -> (i32, i32) {
    %c0_i32 = arith.constant 0 : i32
    %c0_i32_0 = arith.constant 0 : i32
    %c0_i32_1 = arith.constant 0 : i32
    return %c0_i32, %c0_i32_0 : i32, i32
  }
  func.func @transform_3(%arg0: i32) -> (i32, i32) {
    %c0_i32 = arith.constant 0 : i32
    %c0_i32_0 = arith.constant 0 : i32
    %c0_i32_1 = arith.constant 0 : i32
    return %c0_i32, %c0_i32_0 : i32, i32
  }
  func.func @transform_4(%arg0: i32) -> (i32, i32) {
    %c0_i32 = arith.constant 0 : i32
    %c0_i32_0 = arith.constant 0 : i32
    %c0_i32_1 = arith.constant 0 : i32
    return %c0_i32, %c0_i32_0 : i32, i32
  }
  func.func @transform_5(%arg0: i32) -> (i32, i32) {
    %c0_i32 = arith.constant 0 : i32
    %c0_i32_0 = arith.constant 0 : i32
    return %arg0, %c0_i32 : i32, i32
  }
}

module attributes {stable_mosaic.version = 11 : i64} {
  func.func @_point_head_kernel(%arg0: i32, %arg1: memref<16x16x8xbf16, #tpu.memory_space<vmem>>, %arg2: memref<8x8xbf16, #tpu.memory_space<vmem>>, %arg3: memref<1x8xf32, #tpu.memory_space<vmem>>, %arg4: memref<1x8xf32, #tpu.memory_space<vmem>>, %arg5: memref<1x1xf32, #tpu.memory_space<vmem>>, %arg6: memref<16x1xf32, #tpu.memory_space<vmem>>) attributes {dimension_semantics = [#tpu.dimension_semantics<parallel>], iteration_bounds = array<i64: 1>, scalar_prefetch = 0 : i64, scratch_operands = 0 : i64, tpu.core_type = #tpu.core_type<tc>, window_params = [{transform_indices = @transform_0, window_bounds = array<i64: 16, 16, 8>}, {pipeline_mode = #tpu.pipeline_mode<synchronous>, transform_indices = @transform_1, window_bounds = array<i64: 8, 8>}, {pipeline_mode = #tpu.pipeline_mode<synchronous>, transform_indices = @transform_2, window_bounds = array<i64: 1, 8>}, {pipeline_mode = #tpu.pipeline_mode<synchronous>, transform_indices = @transform_3, window_bounds = array<i64: 1, 8>}, {pipeline_mode = #tpu.pipeline_mode<synchronous>, transform_indices = @transform_4, window_bounds = array<i64: 1, 1>}, {transform_indices = @transform_5, window_bounds = array<i64: 16, 1>}]} {
    %c0 = arith.constant 0 : index
    %c0_0 = arith.constant 0 : index
    %c0_1 = arith.constant 0 : index
    %0 = vector.load %arg1[%c0, %c0_0, %c0_1] : memref<16x16x8xbf16, #tpu.memory_space<vmem>>, vector<16x16x8xbf16>
    %1 = arith.extf %0 : vector<16x16x8xbf16> to vector<16x16x8xf32>
    %cst = arith.constant dense<0xFF800000> : vector<16x8xf32>
    %2 = vector.multi_reduction <maximumf>, %1, %cst [1] : vector<16x16x8xf32> to vector<16x8xf32>
    %3 = arith.truncf %2 : vector<16x8xf32> to vector<16x8xbf16>
    %c0_2 = arith.constant 0 : index
    %c0_3 = arith.constant 0 : index
    %4 = vector.load %arg2[%c0_2, %c0_3] : memref<8x8xbf16, #tpu.memory_space<vmem>>, vector<8x8xbf16>
    %cst_4 = arith.constant dense<0.000000e+00> : vector<16x8xf32>
    %5 = tpu.matmul %3, %4, %cst_4 {dimension_numbers = #tpu.dot_dimension_numbers<[1], [0], [0], [1], [0, 0, 1, 1], [], []>} : vector<16x8xbf16>, vector<8x8xbf16>, vector<16x8xf32> -> vector<16x8xf32>
    %c0_5 = arith.constant 0 : index
    %c0_6 = arith.constant 0 : index
    %6 = vector.load %arg3[%c0_5, %c0_6] : memref<1x8xf32, #tpu.memory_space<vmem>>, vector<1x8xf32>
    %7 = vector.broadcast %6 : vector<1x8xf32> to vector<16x8xf32>
    %8 = arith.addf %5, %7 : vector<16x8xf32>
    %cst_7 = arith.constant 0.000000e+00 : f32
    %9 = vector.broadcast %cst_7 : f32 to vector<16x8xf32>
    %10 = arith.maximumf %8, %9 : vector<16x8xf32>
    %c0_8 = arith.constant 0 : index
    %c0_9 = arith.constant 0 : index
    %11 = vector.load %arg4[%c0_8, %c0_9] : memref<1x8xf32, #tpu.memory_space<vmem>>, vector<1x8xf32>
    %12 = vector.broadcast %11 : vector<1x8xf32> to vector<16x8xf32>
    %13 = arith.mulf %10, %12 : vector<16x8xf32>
    %cst_10 = arith.constant dense<0.000000e+00> : vector<16xf32>
    %14 = vector.multi_reduction <add>, %13, %cst_10 [1] : vector<16x8xf32> to vector<16xf32>
    %15 = vector.shape_cast %14 : vector<16xf32> to vector<16x1xf32>
    %c0_11 = arith.constant 0 : index
    %c0_12 = arith.constant 0 : index
    %16 = vector.load %arg5[%c0_11, %c0_12] : memref<1x1xf32, #tpu.memory_space<vmem>>, vector<1x1xf32>
    %17 = vector.broadcast %16 : vector<1x1xf32> to vector<16x1xf32>
    %18 = arith.addf %15, %17 : vector<16x1xf32>
    %c0_13 = arith.constant 0 : index
    %c0_14 = arith.constant 0 : index
    %19 = vector.load %arg6[%c0_13, %c0_14] : memref<16x1xf32, #tpu.memory_space<vmem>>, vector<16x1xf32>
    tpu.vector_store %arg6[%c0_13, %c0_14], %18 {strides = array<i32>} : memref<16x1xf32, #tpu.memory_space<vmem>>, vector<16x1xf32>,
    return
  }
  func.func @transform_0(%arg0: i32) -> (i32, i32, i32) {
    %c0_i32 = arith.constant 0 : i32
    %c0_i32_0 = arith.constant 0 : i32
    %c0_i32_1 = arith.constant 0 : i32
    return %arg0, %c0_i32, %c0_i32_0 : i32, i32, i32
  }
  func.func @transform_1(%arg0: i32) -> (i32, i32) {
    %c0_i32 = arith.constant 0 : i32
    %c0_i32_0 = arith.constant 0 : i32
    %c0_i32_1 = arith.constant 0 : i32
    return %c0_i32, %c0_i32_0 : i32, i32
  }
  func.func @transform_2(%arg0: i32) -> (i32, i32) {
    %c0_i32 = arith.constant 0 : i32
    %c0_i32_0 = arith.constant 0 : i32
    %c0_i32_1 = arith.constant 0 : i32
    return %c0_i32, %c0_i32_0 : i32, i32
  }
  func.func @transform_3(%arg0: i32) -> (i32, i32) {
    %c0_i32 = arith.constant 0 : i32
    %c0_i32_0 = arith.constant 0 : i32
    %c0_i32_1 = arith.constant 0 : i32
    return %c0_i32, %c0_i32_0 : i32, i32
  }
  func.func @transform_4(%arg0: i32) -> (i32, i32) {
    %c0_i32 = arith.constant 0 : i32
    %c0_i32_0 = arith.constant 0 : i32
    %c0_i32_1 = arith.constant 0 : i32
    return %c0_i32, %c0_i32_0 : i32, i32
  }
  func.func @transform_5(%arg0: i32) -> (i32, i32) {
    %c0_i32 = arith.constant 0 : i32
    %c0_i32_0 = arith.constant 0 : i32
    return %arg0, %c0_i32 : i32, i32
  }
}

</mosaic_0001>

<bundles_post_ra>
// kernel: tpu_custom_call.1
= control target key start
LH: loop header
LB: loop body
LE: loop exit
PB: predicated region body
PF: predicated region fallthrough
CT: control target
= control target key end

     0   :  { %vm313_vm0 = vcmask 1043456   ;;  %v484_v0 = vmov 0.0   ;;  %vm485_vm1 = vmmov 0   ;;  %vm87_vm2 = vcmask 64512   ;;  %s709_s1 = inlined_call_operand.vmem [shape: bf16[8,8], index: 1, kind: input, shape index: {}]   ;;  %s710_s0 = inlined_call_operand.vmem [shape: bf16[16,16,8], index: 0, kind: input, shape index: {}]   ;;  %s711_s4 = inlined_call_operand.<no memory space> [shape: f32[1,1], index: 4, kind: input, shape index: {}]   ;;  %s712_s2 = inlined_call_operand.vmem [shape: f32[1,8], index: 2, kind: input, shape index: {}]   ;;  %s713_s3 = inlined_call_operand.vmem [shape: f32[1,8], index: 3, kind: input, shape index: {}]   ;;  %s714_s5 = inlined_call_operand.vmem [shape: f32[16,1], index: 5, kind: output, shape index: {}]  }
   0x1   :  { %476 = vmatprep.subr.bf16.mxu0 %v484_v0  ;;  %v248_v1 = vld [vmem:[%s709_s1] sm:$0xf]  ;;  %478 = vmatprep.mubr.msk.bf16.mxu0 %vm485_vm1, %v484_v0  ;;  %v459_v3 = vld [vmem:[%s710_s0 + $0x8] sm:$0xff]   ;;  %v460_v5 = vld [vmem:[%s710_s0 + $0x10] sm:$0xff]   ;;  %vm288_vm3 = vcmask 1041409   ;;  %vm290_vm4 = vcmask 1042434  }
   0x2   :  { %v396_v2 = vld [vmem:[%s710_s0] sm:$0xff]   ;;  %v315_v4 = vsel %vm313_vm0, %v248_v1, 0  ;;  %v461_v6 = vld [vmem:[%s710_s0 + $0x18] sm:$0xff]   ;;  %v401_v10 = vunpack.c.l.bf16 %v459_v3  ;;  %v463_v11 = vld [vmem:[%s710_s0 + $0x28] sm:$0xff]   ;;  %v402_v14 = vunpack.c.h.bf16 %v459_v3  ;;  %v405_v15 = vunpack.c.l.bf16 %v460_v5 }
   0x3   :  { %v462_v7 = vld [vmem:[%s710_s0 + $0x20] sm:$0xff]   ;;  %477 = vmatpush3.bf16.msra.mxu0 %v315_v4  ;;  %v397_v8 = vunpack.c.l.bf16 %v396_v2  ;;  %v398_v9 = vunpack.c.h.bf16 %v396_v2  ;;  %v540_v12 = vld [vmem:[%s710_s0 + $0x30] sm:$0xff]   ;;  %v545_v13 = vld [vmem:[%s710_s0 + $0x38] sm:$0xff]   ;;  %v406_v16 = vunpack.c.h.bf16 %v460_v5  ;;  %v409_v17 = vunpack.c.l.bf16 %v461_v6 }
   0x4   :  { %v550_v18 = vld [vmem:[%s710_s0 + $0x40] sm:$0xff]   ;;  %v555_v19 = vld [vmem:[%s710_s0 + $0x48] sm:$0xff]   ;;  %v410_v20 = vunpack.c.h.bf16 %v461_v6  ;;  %v413_v21 = vunpack.c.l.bf16 %v462_v7  ;;  %v414_v22 = vunpack.c.h.bf16 %v462_v7  ;;  %v417_v23 = vunpack.c.l.bf16 %v463_v11  ;;  %v560_v24 = vld [vmem:[%s710_s0 + $0x50] sm:$0xff]  }
   0x5   :  { %v565_v25 = vld [vmem:[%s710_s0 + $0x58] sm:$0xff]   ;;  %v418_v26 = vunpack.c.h.bf16 %v463_v11  ;;  %v421_v27 = vunpack.c.l.bf16 %v540_v12  ;;  %v422_v28 = vunpack.c.h.bf16 %v540_v12  ;;  %v425_v29 = vunpack.c.l.bf16 %v545_v13  ;;  %v573_v30 = vld [vmem:[%s710_s0 + $0x60] sm:$0xff]   ;;  %v578_v31 = vld [vmem:[%s710_s0 + $0x68] sm:$0xff]  }
   0x6   :  { %v426_v32 = vunpack.c.h.bf16 %v545_v13  ;;  %v429_v33 = vunpack.c.l.bf16 %v550_v18  ;;  %v430_v34 = vunpack.c.h.bf16 %v550_v18  ;;  %v433_v35 = vunpack.c.l.bf16 %v555_v19 }
   0x7   :  { %v434_v36 = vunpack.c.h.bf16 %v555_v19  ;;  %v437_v37 = vunpack.c.l.bf16 %v560_v24  ;;  %v438_v38 = vunpack.c.h.bf16 %v560_v24  ;;  %v441_v39 = vunpack.c.l.bf16 %v565_v25 }
   0x8   :  { %v442_v40 = vunpack.c.h.bf16 %v565_v25  ;;  %v445_v41 = vunpack.c.l.bf16 %v573_v30  ;;  %v446_v42 = vunpack.c.h.bf16 %v573_v30  ;;  %v449_v43 = vunpack.c.l.bf16 %v578_v31 }
   0x9   :  { %v450_v44 = vunpack.c.h.bf16 %v578_v31  ;;  %v88_v45 = vsel %vm87_vm2, %v397_v8, -inf  ;;  %v89_v46 = vsel %vm87_vm2, %v398_v9, -inf  ;;  %v97_v47 = vsel %vm87_vm2, %v401_v10, -inf }
   0xa   :  { %v90_v48 = vmax.f32 %v88_v45, %v89_v46  ;;  %v98_v49 = vsel %vm87_vm2, %v402_v14, -inf  ;;  %v106_v50 = vsel %vm87_vm2, %v405_v15, -inf  ;;  %v107_v51 = vsel %vm87_vm2, %v406_v16, -inf  ;;  %v611_v16 = vld [vmem:[%s710_s0 + $0x70] sm:$0xff]  }
   0xb   :  { %v99_v52 = vmax.f32 %v97_v47, %v98_v49  ;;  %v108_v53 = vmax.f32 %v106_v50, %v107_v51  ;;  %v115_v54 = vsel %vm87_vm2, %v409_v17, -inf  ;;  %v116_v55 = vsel %vm87_vm2, %v410_v20, -inf }
   0xc   :  { %v91_v56 = vrot.slane %v90_v48, 4  ;;  %v117_v57 = vmax.f32 %v115_v54, %v116_v55  ;;  %v124_v58 = vsel %vm87_vm2, %v413_v21, -inf  ;;  %v125_v59 = vsel %vm87_vm2, %v414_v22, -inf }
   0xd   :  { %v100_v60 = vrot.slane %v99_v52, 4  ;;  %v109_v61 = vrot.slane %v108_v53, 4  ;;  %v126_v62 = vmax.f32 %v124_v58, %v125_v59  ;;  %v133_v63 = vsel %vm87_vm2, %v417_v23, -inf }
   0xe   :  { %v92_v0 = vmax.f32 %v90_v48, %v91_v56  ;;  %v118_v1 = vrot.slane %v117_v57, 4  ;;  %v134_v2 = vsel %vm87_vm2, %v418_v26, -inf  ;;  %v142_v3 = vsel %vm87_vm2, %v421_v27, -inf }
   0xf   :  { %v101_v4 = vmax.f32 %v99_v52, %v100_v60  ;;  %v110_v5 = vmax.f32 %v108_v53, %v109_v61  ;;  %v127_v6 = vrot.slane %v126_v62, 4  ;;  %v135_v7 = vmax.f32 %v133_v63, %v134_v2 }
  0x10   :  { %v93_v8 = vrot.slane %v92_v0, 2  ;;  %v119_v9 = vmax.f32 %v117_v57, %v118_v1  ;;  %v143_v10 = vsel %vm87_vm2, %v422_v28, -inf  ;;  %v151_v11 = vsel %vm87_vm2, %v425_v29, -inf  ;;  %v617_v29 = vld [vmem:[%s710_s0 + $0x78] sm:$0xff]  }
  0x11   :  { %v102_v12 = vrot.slane %v101_v4, 2  ;;  %v111_v13 = vrot.slane %v110_v5, 2  ;;  %v128_v14 = vmax.f32 %v126_v62, %v127_v6  ;;  %v136_v15 = vrot.slane %v135_v7, 4 }
  0x12   :  { %v94_v17 = vmax.f32 %v92_v0, %v93_v8  ;;  %v120_v20 = vrot.slane %v119_v9, 2  ;;  %v144_v21 = vmax.f32 %v142_v3, %v143_v10  ;;  %v152_v22 = vsel %vm87_vm2, %v426_v32, -inf }
  0x13   :  { %v103_v23 = vmax.f32 %v101_v4, %v102_v12  ;;  %v112_v26 = vmax.f32 %v110_v5, %v111_v13  ;;  %v129_v27 = vrot.slane %v128_v14, 2  ;;  %v137_v28 = vmax.f32 %v135_v7, %v136_v15 }
  0x14   :  { %v95_v45 = vrot.slane %v94_v17, 1  ;;  %v121_v46 = vmax.f32 %v119_v9, %v120_v20  ;;  %v145_v47 = vrot.slane %v144_v21, 4  ;;  %v153_v48 = vmax.f32 %v151_v11, %v152_v22 }
  0x15   :  { %v453_v49 = vunpack.c.l.bf16 %v611_v16  ;;  %v104_v50 = vrot.slane %v103_v23, 1  ;;  %v113_v51 = vrot.slane %v112_v26, 1  ;;  %v130_v52 = vmax.f32 %v128_v14, %v129_v27 }
  0x16   :  { %v454_v32 = vunpack.c.h.bf16 %v611_v16  ;;  %v138_v53 = vrot.slane %v137_v28, 2  ;;  %v146_v54 = vmax.f32 %v144_v21, %v145_v47  ;;  %v154_v55 = vrot.slane %v153_v48, 4 }
  0x17   :  { %v457_v56 = vunpack.c.l.bf16 %v617_v29  ;;  %v458_v57 = vunpack.c.h.bf16 %v617_v29  ;;  %v623_v58 = vmax.f32 %v94_v17, %v95_v45  ;;  %v122_v59 = vrot.slane %v121_v46, 1 }
  0x18   :  { %v131_v60 = vrot.slane %v130_v52, 1  ;;  %v147_v61 = vrot.slane %v146_v54, 2  ;;  %v155_v62 = vmax.f32 %v153_v48, %v154_v55  ;;  %v160_v63 = vsel %vm87_vm2, %v429_v33, -inf }
  0x19   :  { %v628_v0 = vmax.f32 %v103_v23, %v104_v50  ;;  %v630_v1 = vmax.f32 %v112_v26, %v113_v51  ;;  %v161_v2 = vsel %vm87_vm2, %v430_v34, -inf  ;;  %v169_v3 = vsel %vm87_vm2, %v433_v35, -inf }
  0x1a   :  { %v139_v4 = vmax.f32 %v137_v28, %v138_v53  ;;  %v156_v5 = vrot.slane %v155_v62, 2  ;;  %v162_v6 = vmax.f32 %v160_v63, %v161_v2  ;;  %v170_v7 = vsel %vm87_vm2, %v434_v36, -inf }
  0x1b   :  { %v641_v33 = vmax.f32 %v121_v46, %v122_v59  ;;  %v171_v8 = vmax.f32 %v169_v3, %v170_v7  ;;  %v178_v18 = vsel %vm87_vm2, %v437_v37, -inf  ;;  %v179_v34 = vsel %vm87_vm2, %v438_v38, -inf }
  0x1c   :  { %v649_v9 = vmax.f32 %v130_v52, %v131_v60  ;;  %v148_v35 = vmax.f32 %v146_v54, %v147_v61  ;;  %v163_v10 = vrot.slane %v162_v6, 4  ;;  %v180_v11 = vmax.f32 %v178_v18, %v179_v34 }
  0x1d   :  { %v172_v12 = vrot.slane %v171_v8, 4  ;;  %v187_v19 = vsel %vm87_vm2, %v441_v39, -inf  ;;  %v188_v36 = vsel %vm87_vm2, %v442_v40, -inf  ;;  %v196_v24 = vsel %vm87_vm2, %v445_v41, -inf }
  0x1e   :  { %v140_v37 = vrot.slane %v139_v4, 1  ;;  %v157_v38 = vmax.f32 %v155_v62, %v156_v5  ;;  %v164_v13 = vmax.f32 %v162_v6, %v163_v10  ;;  %v181_v14 = vrot.slane %v180_v11, 4 }
  0x1f   :  { %v173_v15 = vmax.f32 %v171_v8, %v172_v12  ;;  %v189_v16 = vmax.f32 %v187_v19, %v188_v36  ;;  %v197_v17 = vsel %vm87_vm2, %v446_v42, -inf  ;;  %v205_v25 = vsel %vm87_vm2, %v449_v43, -inf }
  0x20   :  { %v149_v39 = vrot.slane %v148_v35, 1  ;;  %v165_v40 = vrot.slane %v164_v13, 2  ;;  %v182_v20 = vmax.f32 %v180_v11, %v181_v14  ;;  %v198_v21 = vmax.f32 %v196_v24, %v197_v17 }
  0x21   :  { %v174_v22 = vrot.slane %v173_v15, 2  ;;  %v190_v41 = vrot.slane %v189_v16, 4  ;;  %v206_v23 = vsel %vm87_vm2, %v450_v44, -inf  ;;  %v214_v26 = vsel %vm87_vm2, %v453_v49, -inf }
  0x22   :  { %v166_v27 = vmax.f32 %v164_v13, %v165_v40  ;;  %v183_v30 = vrot.slane %v182_v20, 2  ;;  %v199_v28 = vrot.slane %v198_v21, 4  ;;  %v207_v42 = vmax.f32 %v205_v25, %v206_v23 }
  0x23   :  { %v158_v29 = vrot.slane %v157_v38, 1  ;;  %v175_v45 = vmax.f32 %v173_v15, %v174_v22  ;;  %v191_v46 = vmax.f32 %v189_v16, %v190_v41  ;;  %v215_v43 = vsel %vm87_vm2, %v454_v32, -inf }
  0x24   :  { %v184_v47 = vmax.f32 %v182_v20, %v183_v30  ;;  %v200_v48 = vmax.f32 %v198_v21, %v199_v28  ;;  %v208_v50 = vrot.slane %v207_v42, 4  ;;  %v223_v51 = vsel %vm87_vm2, %v457_v56, -inf }
  0x25   :  { %v167_v52 = vrot.slane %v166_v27, 1  ;;  %v192_v31 = vrot.slane %v191_v46, 2  ;;  %v216_v53 = vmax.f32 %v214_v26, %v215_v43  ;;  %v224_v44 = vsel %vm87_vm2, %v458_v57, -inf }
  0x26   :  { %v176_v49 = vrot.slane %v175_v45, 1  ;;  %v185_v54 = vrot.slane %v184_v47, 1  ;;  %v201_v55 = vrot.slane %v200_v48, 2  ;;  %v209_v59 = vmax.f32 %v207_v42, %v208_v50 }
  0x27   :  { %v141_v60 = vmax.f32 %v139_v4, %v140_v37  ;;  %v193_v61 = vmax.f32 %v191_v46, %v192_v31  ;;  %v217_v62 = vrot.slane %v216_v53, 4  ;;  %v225_v63 = vmax.f32 %v223_v51, %v224_v44 }
  0x28   :  { %v150_v2 = vmax.f32 %v148_v35, %v149_v39  ;;  %v159_v32 = vmax.f32 %v157_v38, %v158_v29  ;;  %v202_v3 = vmax.f32 %v200_v48, %v201_v55  ;;  %v210_v5 = vrot.slane %v209_v59, 2 }
  0x29   :  { %v168_v6 = vmax.f32 %v166_v27, %v167_v52  ;;  %v194_v7 = vrot.slane %v193_v61, 1  ;;  %v218_v56 = vmax.f32 %v216_v53, %v217_v62  ;;  %v226_v8 = vrot.slane %v225_v63, 4 }
  0x2a   :  { %v177_v18 = vmax.f32 %v175_v45, %v176_v49  ;;  %v186_v34 = vmax.f32 %v184_v47, %v185_v54  ;;  %v203_v57 = vrot.slane %v202_v3, 1  ;;  %v211_v10 = vmax.f32 %v209_v59, %v210_v5 }
  0x2b   :  { %v219_v11 = vrot.slane %v218_v56, 2  ;;  %v227_v12 = vmax.f32 %v225_v63, %v226_v8  ;;  %v232_v4 = vpack.c.bf16 %v623_v58, %v623_v58  ;;  %v233_v35 = vpack.c.bf16 %v628_v0, %v628_v0 }
  0x2c   :  { %v195_v19 = vmax.f32 %v193_v61, %v194_v7  ;;  %v212_v36 = vrot.slane %v211_v10, 1  ;;  %v234_v24 = vpack.c.bf16 %v630_v1, %v630_v1  ;;  %v235_v37 = vpack.c.bf16 %v641_v33, %v641_v33 }
  0x2d   :  { %v204_v38 = vmax.f32 %v202_v3, %v203_v57  ;;  %v220_v13 = vmax.f32 %v218_v56, %v219_v11  ;;  %v228_v14 = vrot.slane %v227_v12, 2  ;;  %v236_v15 = vpack.c.bf16 %v649_v9, %v649_v9 }
  0x2e   :  { %v213_v16 = vmax.f32 %v211_v10, %v212_v36  ;;  %v237_v17 = vpack.c.bf16 %v141_v60, %v141_v60  ;;  %v238_v58 = vpack.c.bf16 %v150_v2, %v150_v2  ;;  %v239_v25 = vpack.c.bf16 %v159_v32, %v159_v32 }
  0x2f   :  { %v221_v39 = vrot.slane %v220_v13, 1  ;;  %v229_v0 = vmax.f32 %v227_v12, %v228_v14  ;;  %v240_v40 = vpack.c.bf16 %v168_v6, %v168_v6  ;;  %v241_v20 = vpack.c.bf16 %v177_v18, %v177_v18 }
  0x30   :  { %v242_v21 = vpack.c.bf16 %v186_v34, %v186_v34  ;;  %v243_v22 = vpack.c.bf16 %v195_v19, %v195_v19  ;;  %v272_v1 = vunpack.c.l.b16 %v232_v4  ;;  %v273_v41 = vunpack.c.l.b16 %v233_v35  ;;  %v391_v34 = vld [vmem:[%s712_s2] ss:$0 sm:$0xff] }
  0x31   :  { %v222_v23 = vmax.f32 %v220_v13, %v221_v39  ;;  %v230_v33 = vrot.slane %v229_v0, 1  ;;  %v244_v26 = vpack.c.bf16 %v204_v38, %v204_v38  ;;  %v274_v27 = vunpack.c.l.b16 %v234_v24  ;;  %v393_v4 = vld [vmem:[%s713_s3] ss:$0 sm:$0xff] }
  0x32   :  { %v245_v30 = vpack.c.bf16 %v213_v16, %v213_v16  ;;  %v275_v28 = vunpack.c.l.b16 %v235_v37  ;;  %v276_v42 = vunpack.c.l.b16 %v236_v15  ;;  %v277_v9 = vunpack.c.l.b16 %v237_v17 }
  0x33   :  { %v231_v29 = vmax.f32 %v229_v0, %v230_v33  ;;  %v278_v45 = vunpack.c.l.b16 %v238_v58  ;;  %v280_v46 = vunpack.c.l.b16 %v240_v40  ;;  %v281_v43 = vunpack.c.l.b16 %v241_v20 }
  0x34   :  { %v246_v47 = vpack.c.bf16 %v222_v23, %v222_v23  ;;  %v282_v48 = vunpack.c.l.b16 %v242_v21  ;;  %v289_v50 = vsel %vm288_vm3, %v273_v41, %v272_v1  ;;  %vm292_vm5 = vcmask 1043459  }
  0x35   :  { %v247_v51 = vpack.c.bf16 %v231_v29, %v231_v29  ;;  %v283_v52 = vunpack.c.l.b16 %v243_v22  ;;  %v291_v31 = vsel %vm290_vm4, %v274_v27, %v289_v50  ;;  %vm294_vm6 = vcmask 1044484  }
  0x36   :  { %v284_v53 = vunpack.c.l.b16 %v244_v26  ;;  %v293_v44 = vsel %vm292_vm5, %v275_v28, %v291_v31  ;;  %vm296_vm7 = vcmask 1045509   ;;  %vm298_vm8 = vcmask 1046534  }
  0x37   :  { %v279_v49 = vunpack.c.l.b16 %v239_v25  ;;  %v285_v54 = vunpack.c.l.b16 %v245_v30  ;;  %v295_v55 = vsel %vm294_vm6, %v276_v42, %v293_v44  ;;  %v302_v59 = vsel %vm288_vm3, %v281_v43, %v280_v46 }
  0x38   :  { %v286_v60 = vunpack.c.l.b16 %v246_v47  ;;  %v297_v61 = vsel %vm296_vm7, %v277_v9, %v295_v55  ;;  %vm300_vm9 = vcmask 1047559   ;;  %v303_v62 = vsel %vm290_vm4, %v282_v48, %v302_v59 }
  0x39   :  { %v287_v63 = vunpack.c.l.b16 %v247_v51  ;;  %v299_v2 = vsel %vm298_vm8, %v278_v45, %v297_v61  ;;  %v304_v32 = vsel %vm292_vm5, %v283_v52, %v303_v62  ;;  %v10_v18 = vstv %s711_s4 }
  0x3a   :  { %v305_v3 = vsel %vm294_vm6, %v284_v53, %v304_v32  ;;  %v301_v5 = vsel %vm300_vm9, %v279_v49, %v299_v2  ;;  %11 = vst [vmem:[#allocation2] sm:$0x1] %v10_v18  ;;  %vm384_vm10 = vcmask 7168  }
  0x3b   :  { %v306_v6 = vsel %vm296_vm7, %v285_v54, %v305_v3 }
  0x3c   :  { %v307_v7 = vsel %vm298_vm8, %v286_v60, %v306_v6 }
  0x3d   :  { %v308_v56 = vsel %vm300_vm9, %v287_v63, %v307_v7 }
  0x3e   :  { %v309_v8 = vpack.c.b16 %v308_v56, %v301_v5 }
  0x40   :  { %479 = vmatmul.mubr.msk.bf16.vlgmr.msra.gmra.mrb[0].mxu0 %vm87_vm2, %v309_v8 }
  0x41   :  { %v394_v15 = vld [vmem:[#allocation2] ss:$0 sm:$0xff] }
 0x113   :  { %v351_v57 = vpop.f32.mrb[0].mxu0 }
 0x114   :  { %v352_v10 = vadd.f32 %v391_v34, %v351_v57  ;;  %v480_v11 = vpop.f32.mrb[1].mxu0 }
 0x115   :  { %v354_v12 = vpop.f32.mrb[2].mxu0 }
 0x116   :  { %v358_v35 = vmax.f32 %v352_v10, 0.0  ;;  %v355_v19 = vadd.f32 %v391_v34, %v354_v12  ;;  %v481_v36 = vpop.f32.mrb[3].mxu0 }
 0x118   :  { %v359_v24 = vmax.f32 %v355_v19, 0.0  ;;  %v367_v37 = vmul.f32 %v393_v4, %v358_v35 }
 0x11a   :  { %v369_v38 = vsel %vm87_vm2, %v367_v37, 0.0  ;;  %v368_v13 = vmul.f32 %v393_v4, %v359_v24 }
 0x11b   :  { %370 = vadd.xlane.f32.xlu0 %v369_v38 }
 0x11c   :  { %v372_v14 = vsel %vm87_vm2, %v368_v13, 0.0 }
 0x11f   :  { %373 = vadd.xlane.f32.xlu0 %v372_v14 }
 0x1a8   :  { %v371_v16 = vpop.xlane.xlu0 %370 }
 0x1a9   :  { %v382_v17 = vadd.f32 %v394_v15, %v371_v16 }
 0x1ab   :  { %385 = vst.msk [vmem:[%s714_s5] sm:$0xff] %vm384_vm10, %v382_v17 }
 0x1ac   :  { %v374_v58 = vpop.xlane.xlu0 %373 }
 0x1ad   :  { %v383_v25 = vadd.f32 %v394_v15, %v374_v58 }
 0x1af   :  { %386 = vst.msk [vmem:[%s714_s5 + $0x8] sm:$0xff] %vm384_vm10, %v383_v25 }

// kernel: tpu_custom_call.1
= control target key start
LH: loop header
LB: loop body
LE: loop exit
PB: predicated region body
PF: predicated region fallthrough
CT: control target
= control target key end

     0   :  { %vm313_vm0 = vcmask 1043456   ;;  %v484_v0 = vmov 0.0   ;;  %vm485_vm1 = vmmov 0   ;;  %vm87_vm2 = vcmask 64512   ;;  %s709_s1 = inlined_call_operand.vmem [shape: bf16[8,8], index: 1, kind: input, shape index: {}]   ;;  %s710_s0 = inlined_call_operand.vmem [shape: bf16[16,16,8], index: 0, kind: input, shape index: {}]   ;;  %s711_s4 = inlined_call_operand.<no memory space> [shape: f32[1,1], index: 4, kind: input, shape index: {}]   ;;  %s712_s2 = inlined_call_operand.vmem [shape: f32[1,8], index: 2, kind: input, shape index: {}]   ;;  %s713_s3 = inlined_call_operand.vmem [shape: f32[1,8], index: 3, kind: input, shape index: {}]   ;;  %s714_s5 = inlined_call_operand.vmem [shape: f32[16,1], index: 5, kind: output, shape index: {}]  }
   0x1   :  { %476 = vmatprep.subr.bf16.mxu0 %v484_v0  ;;  %v248_v1 = vld [vmem:[%s709_s1] sm:$0xf]  ;;  %478 = vmatprep.mubr.msk.bf16.mxu0 %vm485_vm1, %v484_v0  ;;  %v459_v3 = vld [vmem:[%s710_s0 + $0x8] sm:$0xff]   ;;  %v460_v5 = vld [vmem:[%s710_s0 + $0x10] sm:$0xff]   ;;  %vm288_vm3 = vcmask 1041409   ;;  %vm290_vm4 = vcmask 1042434  }
   0x2   :  { %v396_v2 = vld [vmem:[%s710_s0] sm:$0xff]   ;;  %v315_v4 = vsel %vm313_vm0, %v248_v1, 0  ;;  %v461_v6 = vld [vmem:[%s710_s0 + $0x18] sm:$0xff]   ;;  %v401_v10 = vunpack.c.l.bf16 %v459_v3  ;;  %v463_v11 = vld [vmem:[%s710_s0 + $0x28] sm:$0xff]   ;;  %v402_v14 = vunpack.c.h.bf16 %v459_v3  ;;  %v405_v15 = vunpack.c.l.bf16 %v460_v5 }
   0x3   :  { %v462_v7 = vld [vmem:[%s710_s0 + $0x20] sm:$0xff]   ;;  %477 = vmatpush3.bf16.msra.mxu0 %v315_v4  ;;  %v397_v8 = vunpack.c.l.bf16 %v396_v2  ;;  %v398_v9 = vunpack.c.h.bf16 %v396_v2  ;;  %v540_v12 = vld [vmem:[%s710_s0 + $0x30] sm:$0xff]   ;;  %v545_v13 = vld [vmem:[%s710_s0 + $0x38] sm:$0xff]   ;;  %v406_v16 = vunpack.c.h.bf16 %v460_v5  ;;  %v409_v17 = vunpack.c.l.bf16 %v461_v6 }
   0x4   :  { %v550_v18 = vld [vmem:[%s710_s0 + $0x40] sm:$0xff]   ;;  %v555_v19 = vld [vmem:[%s710_s0 + $0x48] sm:$0xff]   ;;  %v410_v20 = vunpack.c.h.bf16 %v461_v6  ;;  %v413_v21 = vunpack.c.l.bf16 %v462_v7  ;;  %v414_v22 = vunpack.c.h.bf16 %v462_v7  ;;  %v417_v23 = vunpack.c.l.bf16 %v463_v11  ;;  %v560_v24 = vld [vmem:[%s710_s0 + $0x50] sm:$0xff]  }
   0x5   :  { %v565_v25 = vld [vmem:[%s710_s0 + $0x58] sm:$0xff]   ;;  %v418_v26 = vunpack.c.h.bf16 %v463_v11  ;;  %v421_v27 = vunpack.c.l.bf16 %v540_v12  ;;  %v422_v28 = vunpack.c.h.bf16 %v540_v12  ;;  %v425_v29 = vunpack.c.l.bf16 %v545_v13  ;;  %v573_v30 = vld [vmem:[%s710_s0 + $0x60] sm:$0xff]   ;;  %v578_v31 = vld [vmem:[%s710_s0 + $0x68] sm:$0xff]  }
   0x6   :  { %v426_v32 = vunpack.c.h.bf16 %v545_v13  ;;  %v429_v33 = vunpack.c.l.bf16 %v550_v18  ;;  %v430_v34 = vunpack.c.h.bf16 %v550_v18  ;;  %v433_v35 = vunpack.c.l.bf16 %v555_v19 }
   0x7   :  { %v434_v36 = vunpack.c.h.bf16 %v555_v19  ;;  %v437_v37 = vunpack.c.l.bf16 %v560_v24  ;;  %v438_v38 = vunpack.c.h.bf16 %v560_v24  ;;  %v441_v39 = vunpack.c.l.bf16 %v565_v25 }
   0x8   :  { %v442_v40 = vunpack.c.h.bf16 %v565_v25  ;;  %v445_v41 = vunpack.c.l.bf16 %v573_v30  ;;  %v446_v42 = vunpack.c.h.bf16 %v573_v30  ;;  %v449_v43 = vunpack.c.l.bf16 %v578_v31 }
   0x9   :  { %v450_v44 = vunpack.c.h.bf16 %v578_v31  ;;  %v88_v45 = vsel %vm87_vm2, %v397_v8, -inf  ;;  %v89_v46 = vsel %vm87_vm2, %v398_v9, -inf  ;;  %v97_v47 = vsel %vm87_vm2, %v401_v10, -inf }
   0xa   :  { %v90_v48 = vmax.f32 %v88_v45, %v89_v46  ;;  %v98_v49 = vsel %vm87_vm2, %v402_v14, -inf  ;;  %v106_v50 = vsel %vm87_vm2, %v405_v15, -inf  ;;  %v107_v51 = vsel %vm87_vm2, %v406_v16, -inf  ;;  %v611_v16 = vld [vmem:[%s710_s0 + $0x70] sm:$0xff]  }
   0xb   :  { %v99_v52 = vmax.f32 %v97_v47, %v98_v49  ;;  %v108_v53 = vmax.f32 %v106_v50, %v107_v51  ;;  %v115_v54 = vsel %vm87_vm2, %v409_v17, -inf  ;;  %v116_v55 = vsel %vm87_vm2, %v410_v20, -inf }
   0xc   :  { %v91_v56 = vrot.slane %v90_v48, 4  ;;  %v117_v57 = vmax.f32 %v115_v54, %v116_v55  ;;  %v124_v58 = vsel %vm87_vm2, %v413_v21, -inf  ;;  %v125_v59 = vsel %vm87_vm2, %v414_v22, -inf }
   0xd   :  { %v100_v60 = vrot.slane %v99_v52, 4  ;;  %v109_v61 = vrot.slane %v108_v53, 4  ;;  %v126_v62 = vmax.f32 %v124_v58, %v125_v59  ;;  %v133_v63 = vsel %vm87_vm2, %v417_v23, -inf }
   0xe   :  { %v92_v0 = vmax.f32 %v90_v48, %v91_v56  ;;  %v118_v1 = vrot.slane %v117_v57, 4  ;;  %v134_v2 = vsel %vm87_vm2, %v418_v26, -inf  ;;  %v142_v3 = vsel %vm87_vm2, %v421_v27, -inf }
   0xf   :  { %v101_v4 = vmax.f32 %v99_v52, %v100_v60  ;;  %v110_v5 = vmax.f32 %v108_v53, %v109_v61  ;;  %v127_v6 = vrot.slane %v126_v62, 4  ;;  %v135_v7 = vmax.f32 %v133_v63, %v134_v2 }
  0x10   :  { %v93_v8 = vrot.slane %v92_v0, 2  ;;  %v119_v9 = vmax.f32 %v117_v57, %v118_v1  ;;  %v143_v10 = vsel %vm87_vm2, %v422_v28, -inf  ;;  %v151_v11 = vsel %vm87_vm2, %v425_v29, -inf  ;;  %v617_v29 = vld [vmem:[%s710_s0 + $0x78] sm:$0xff]  }
  0x11   :  { %v102_v12 = vrot.slane %v101_v4, 2  ;;  %v111_v13 = vrot.slane %v110_v5, 2  ;;  %v128_v14 = vmax.f32 %v126_v62, %v127_v6  ;;  %v136_v15 = vrot.slane %v135_v7, 4 }
  0x12   :  { %v94_v17 = vmax.f32 %v92_v0, %v93_v8  ;;  %v120_v20 = vrot.slane %v119_v9, 2  ;;  %v144_v21 = vmax.f32 %v142_v3, %v143_v10  ;;  %v152_v22 = vsel %vm87_vm2, %v426_v32, -inf }
  0x13   :  { %v103_v23 = vmax.f32 %v101_v4, %v102_v12  ;;  %v112_v26 = vmax.f32 %v110_v5, %v111_v13  ;;  %v129_v27 = vrot.slane %v128_v14, 2  ;;  %v137_v28 = vmax.f32 %v135_v7, %v136_v15 }
  0x14   :  { %v95_v45 = vrot.slane %v94_v17, 1  ;;  %v121_v46 = vmax.f32 %v119_v9, %v120_v20  ;;  %v145_v47 = vrot.slane %v144_v21, 4  ;;  %v153_v48 = vmax.f32 %v151_v11, %v152_v22 }
  0x15   :  { %v453_v49 = vunpack.c.l.bf16 %v611_v16  ;;  %v104_v50 = vrot.slane %v103_v23, 1  ;;  %v113_v51 = vrot.slane %v112_v26, 1  ;;  %v130_v52 = vmax.f32 %v128_v14, %v129_v27 }
  0x16   :  { %v454_v32 = vunpack.c.h.bf16 %v611_v16  ;;  %v138_v53 = vrot.slane %v137_v28, 2  ;;  %v146_v54 = vmax.f32 %v144_v21, %v145_v47  ;;  %v154_v55 = vrot.slane %v153_v48, 4 }
  0x17   :  { %v457_v56 = vunpack.c.l.bf16 %v617_v29  ;;  %v458_v57 = vunpack.c.h.bf16 %v617_v29  ;;  %v623_v58 = vmax.f32 %v94_v17, %v95_v45  ;;  %v122_v59 = vrot.slane %v121_v46, 1 }
  0x18   :  { %v131_v60 = vrot.slane %v130_v52, 1  ;;  %v147_v61 = vrot.slane %v146_v54, 2  ;;  %v155_v62 = vmax.f32 %v153_v48, %v154_v55  ;;  %v160_v63 = vsel %vm87_vm2, %v429_v33, -inf }
  0x19   :  { %v628_v0 = vmax.f32 %v103_v23, %v104_v50  ;;  %v630_v1 = vmax.f32 %v112_v26, %v113_v51  ;;  %v161_v2 = vsel %vm87_vm2, %v430_v34, -inf  ;;  %v169_v3 = vsel %vm87_vm2, %v433_v35, -inf }
  0x1a   :  { %v139_v4 = vmax.f32 %v137_v28, %v138_v53  ;;  %v156_v5 = vrot.slane %v155_v62, 2  ;;  %v162_v6 = vmax.f32 %v160_v63, %v161_v2  ;;  %v170_v7 = vsel %vm87_vm2, %v434_v36, -inf }
  0x1b   :  { %v641_v33 = vmax.f32 %v121_v46, %v122_v59  ;;  %v171_v8 = vmax.f32 %v169_v3, %v170_v7  ;;  %v178_v18 = vsel %vm87_vm2, %v437_v37, -inf  ;;  %v179_v34 = vsel %vm87_vm2, %v438_v38, -inf }
  0x1c   :  { %v649_v9 = vmax.f32 %v130_v52, %v131_v60  ;;  %v148_v35 = vmax.f32 %v146_v54, %v147_v61  ;;  %v163_v10 = vrot.slane %v162_v6, 4  ;;  %v180_v11 = vmax.f32 %v178_v18, %v179_v34 }
  0x1d   :  { %v172_v12 = vrot.slane %v171_v8, 4  ;;  %v187_v19 = vsel %vm87_vm2, %v441_v39, -inf  ;;  %v188_v36 = vsel %vm87_vm2, %v442_v40, -inf  ;;  %v196_v24 = vsel %vm87_vm2, %v445_v41, -inf }
  0x1e   :  { %v140_v37 = vrot.slane %v139_v4, 1  ;;  %v157_v38 = vmax.f32 %v155_v62, %v156_v5  ;;  %v164_v13 = vmax.f32 %v162_v6, %v163_v10  ;;  %v181_v14 = vrot.slane %v180_v11, 4 }
  0x1f   :  { %v173_v15 = vmax.f32 %v171_v8, %v172_v12  ;;  %v189_v16 = vmax.f32 %v187_v19, %v188_v36  ;;  %v197_v17 = vsel %vm87_vm2, %v446_v42, -inf  ;;  %v205_v25 = vsel %vm87_vm2, %v449_v43, -inf }
  0x20   :  { %v149_v39 = vrot.slane %v148_v35, 1  ;;  %v165_v40 = vrot.slane %v164_v13, 2  ;;  %v182_v20 = vmax.f32 %v180_v11, %v181_v14  ;;  %v198_v21 = vmax.f32 %v196_v24, %v197_v17 }
  0x21   :  { %v174_v22 = vrot.slane %v173_v15, 2  ;;  %v190_v41 = vrot.slane %v189_v16, 4  ;;  %v206_v23 = vsel %vm87_vm2, %v450_v44, -inf  ;;  %v214_v26 = vsel %vm87_vm2, %v453_v49, -inf }
  0x22   :  { %v166_v27 = vmax.f32 %v164_v13, %v165_v40  ;;  %v183_v30 = vrot.slane %v182_v20, 2  ;;  %v199_v28 = vrot.slane %v198_v21, 4  ;;  %v207_v42 = vmax.f32 %v205_v25, %v206_v23 }
  0x23   :  { %v158_v29 = vrot.slane %v157_v38, 1  ;;  %v175_v45 = vmax.f32 %v173_v15, %v174_v22  ;;  %v191_v46 = vmax.f32 %v189_v16, %v190_v41  ;;  %v215_v43 = vsel %vm87_vm2, %v454_v32, -inf }
  0x24   :  { %v184_v47 = vmax.f32 %v182_v20, %v183_v30  ;;  %v200_v48 = vmax.f32 %v198_v21, %v199_v28  ;;  %v208_v50 = vrot.slane %v207_v42, 4  ;;  %v223_v51 = vsel %vm87_vm2, %v457_v56, -inf }
  0x25   :  { %v167_v52 = vrot.slane %v166_v27, 1  ;;  %v192_v31 = vrot.slane %v191_v46, 2  ;;  %v216_v53 = vmax.f32 %v214_v26, %v215_v43  ;;  %v224_v44 = vsel %vm87_vm2, %v458_v57, -inf }
  0x26   :  { %v176_v49 = vrot.slane %v175_v45, 1  ;;  %v185_v54 = vrot.slane %v184_v47, 1  ;;  %v201_v55 = vrot.slane %v200_v48, 2  ;;  %v209_v59 = vmax.f32 %v207_v42, %v208_v50 }
  0x27   :  { %v141_v60 = vmax.f32 %v139_v4, %v140_v37  ;;  %v193_v61 = vmax.f32 %v191_v46, %v192_v31  ;;  %v217_v62 = vrot.slane %v216_v53, 4  ;;  %v225_v63 = vmax.f32 %v223_v51, %v224_v44 }
  0x28   :  { %v150_v2 = vmax.f32 %v148_v35, %v149_v39  ;;  %v159_v32 = vmax.f32 %v157_v38, %v158_v29  ;;  %v202_v3 = vmax.f32 %v200_v48, %v201_v55  ;;  %v210_v5 = vrot.slane %v209_v59, 2 }
  0x29   :  { %v168_v6 = vmax.f32 %v166_v27, %v167_v52  ;;  %v194_v7 = vrot.slane %v193_v61, 1  ;;  %v218_v56 = vmax.f32 %v216_v53, %v217_v62  ;;  %v226_v8 = vrot.slane %v225_v63, 4 }
  0x2a   :  { %v177_v18 = vmax.f32 %v175_v45, %v176_v49  ;;  %v186_v34 = vmax.f32 %v184_v47, %v185_v54  ;;  %v203_v57 = vrot.slane %v202_v3, 1  ;;  %v211_v10 = vmax.f32 %v209_v59, %v210_v5 }
  0x2b   :  { %v219_v11 = vrot.slane %v218_v56, 2  ;;  %v227_v12 = vmax.f32 %v225_v63, %v226_v8  ;;  %v232_v4 = vpack.c.bf16 %v623_v58, %v623_v58  ;;  %v233_v35 = vpack.c.bf16 %v628_v0, %v628_v0 }
  0x2c   :  { %v195_v19 = vmax.f32 %v193_v61, %v194_v7  ;;  %v212_v36 = vrot.slane %v211_v10, 1  ;;  %v234_v24 = vpack.c.bf16 %v630_v1, %v630_v1  ;;  %v235_v37 = vpack.c.bf16 %v641_v33, %v641_v33 }
  0x2d   :  { %v204_v38 = vmax.f32 %v202_v3, %v203_v57  ;;  %v220_v13 = vmax.f32 %v218_v56, %v219_v11  ;;  %v228_v14 = vrot.slane %v227_v12, 2  ;;  %v236_v15 = vpack.c.bf16 %v649_v9, %v649_v9 }
  0x2e   :  { %v213_v16 = vmax.f32 %v211_v10, %v212_v36  ;;  %v237_v17 = vpack.c.bf16 %v141_v60, %v141_v60  ;;  %v238_v58 = vpack.c.bf16 %v150_v2, %v150_v2  ;;  %v239_v25 = vpack.c.bf16 %v159_v32, %v159_v32 }
  0x2f   :  { %v221_v39 = vrot.slane %v220_v13, 1  ;;  %v229_v0 = vmax.f32 %v227_v12, %v228_v14  ;;  %v240_v40 = vpack.c.bf16 %v168_v6, %v168_v6  ;;  %v241_v20 = vpack.c.bf16 %v177_v18, %v177_v18 }
  0x30   :  { %v242_v21 = vpack.c.bf16 %v186_v34, %v186_v34  ;;  %v243_v22 = vpack.c.bf16 %v195_v19, %v195_v19  ;;  %v272_v1 = vunpack.c.l.b16 %v232_v4  ;;  %v273_v41 = vunpack.c.l.b16 %v233_v35  ;;  %v391_v34 = vld [vmem:[%s712_s2] ss:$0 sm:$0xff] }
  0x31   :  { %v222_v23 = vmax.f32 %v220_v13, %v221_v39  ;;  %v230_v33 = vrot.slane %v229_v0, 1  ;;  %v244_v26 = vpack.c.bf16 %v204_v38, %v204_v38  ;;  %v274_v27 = vunpack.c.l.b16 %v234_v24  ;;  %v393_v4 = vld [vmem:[%s713_s3] ss:$0 sm:$0xff] }
  0x32   :  { %v245_v30 = vpack.c.bf16 %v213_v16, %v213_v16  ;;  %v275_v28 = vunpack.c.l.b16 %v235_v37  ;;  %v276_v42 = vunpack.c.l.b16 %v236_v15  ;;  %v277_v9 = vunpack.c.l.b16 %v237_v17 }
  0x33   :  { %v231_v29 = vmax.f32 %v229_v0, %v230_v33  ;;  %v278_v45 = vunpack.c.l.b16 %v238_v58  ;;  %v280_v46 = vunpack.c.l.b16 %v240_v40  ;;  %v281_v43 = vunpack.c.l.b16 %v241_v20 }
  0x34   :  { %v246_v47 = vpack.c.bf16 %v222_v23, %v222_v23  ;;  %v282_v48 = vunpack.c.l.b16 %v242_v21  ;;  %v289_v50 = vsel %vm288_vm3, %v273_v41, %v272_v1  ;;  %vm292_vm5 = vcmask 1043459  }
  0x35   :  { %v247_v51 = vpack.c.bf16 %v231_v29, %v231_v29  ;;  %v283_v52 = vunpack.c.l.b16 %v243_v22  ;;  %v291_v31 = vsel %vm290_vm4, %v274_v27, %v289_v50  ;;  %vm294_vm6 = vcmask 1044484  }
  0x36   :  { %v284_v53 = vunpack.c.l.b16 %v244_v26  ;;  %v293_v44 = vsel %vm292_vm5, %v275_v28, %v291_v31  ;;  %vm296_vm7 = vcmask 1045509   ;;  %vm298_vm8 = vcmask 1046534  }
  0x37   :  { %v279_v49 = vunpack.c.l.b16 %v239_v25  ;;  %v285_v54 = vunpack.c.l.b16 %v245_v30  ;;  %v295_v55 = vsel %vm294_vm6, %v276_v42, %v293_v44  ;;  %v302_v59 = vsel %vm288_vm3, %v281_v43, %v280_v46 }
  0x38   :  { %v286_v60 = vunpack.c.l.b16 %v246_v47  ;;  %v297_v61 = vsel %vm296_vm7, %v277_v9, %v295_v55  ;;  %vm300_vm9 = vcmask 1047559   ;;  %v303_v62 = vsel %vm290_vm4, %v282_v48, %v302_v59 }
  0x39   :  { %v287_v63 = vunpack.c.l.b16 %v247_v51  ;;  %v299_v2 = vsel %vm298_vm8, %v278_v45, %v297_v61  ;;  %v304_v32 = vsel %vm292_vm5, %v283_v52, %v303_v62  ;;  %v10_v18 = vstv %s711_s4 }
  0x3a   :  { %v305_v3 = vsel %vm294_vm6, %v284_v53, %v304_v32  ;;  %v301_v5 = vsel %vm300_vm9, %v279_v49, %v299_v2  ;;  %11 = vst [vmem:[#allocation2] sm:$0x1] %v10_v18  ;;  %vm384_vm10 = vcmask 7168  }
  0x3b   :  { %v306_v6 = vsel %vm296_vm7, %v285_v54, %v305_v3 }
  0x3c   :  { %v307_v7 = vsel %vm298_vm8, %v286_v60, %v306_v6 }
  0x3d   :  { %v308_v56 = vsel %vm300_vm9, %v287_v63, %v307_v7 }
  0x3e   :  { %v309_v8 = vpack.c.b16 %v308_v56, %v301_v5 }
  0x40   :  { %479 = vmatmul.mubr.msk.bf16.vlgmr.msra.gmra.mrb[0].mxu0 %vm87_vm2, %v309_v8 }
  0x41   :  { %v394_v15 = vld [vmem:[#allocation2] ss:$0 sm:$0xff] }
 0x113   :  { %v351_v57 = vpop.f32.mrb[0].mxu0 }
 0x114   :  { %v352_v10 = vadd.f32 %v391_v34, %v351_v57  ;;  %v480_v11 = vpop.f32.mrb[1].mxu0 }
 0x115   :  { %v354_v12 = vpop.f32.mrb[2].mxu0 }
 0x116   :  { %v358_v35 = vmax.f32 %v352_v10, 0.0  ;;  %v355_v19 = vadd.f32 %v391_v34, %v354_v12  ;;  %v481_v36 = vpop.f32.mrb[3].mxu0 }
 0x118   :  { %v359_v24 = vmax.f32 %v355_v19, 0.0  ;;  %v367_v37 = vmul.f32 %v393_v4, %v358_v35 }
 0x11a   :  { %v369_v38 = vsel %vm87_vm2, %v367_v37, 0.0  ;;  %v368_v13 = vmul.f32 %v393_v4, %v359_v24 }
 0x11b   :  { %370 = vadd.xlane.f32.xlu0 %v369_v38 }
 0x11c   :  { %v372_v14 = vsel %vm87_vm2, %v368_v13, 0.0 }
 0x11f   :  { %373 = vadd.xlane.f32.xlu0 %v372_v14 }
 0x1a8   :  { %v371_v16 = vpop.xlane.xlu0 %370 }
 0x1a9   :  { %v382_v17 = vadd.f32 %v394_v15, %v371_v16 }
 0x1ab   :  { %385 = vst.msk [vmem:[%s714_s5] sm:$0xff] %vm384_vm10, %v382_v17 }
 0x1ac   :  { %v374_v58 = vpop.xlane.xlu0 %373 }
 0x1ad   :  { %v383_v25 = vadd.f32 %v394_v15, %v374_v58 }
 0x1af   :  { %386 = vst.msk [vmem:[%s714_s5 + $0x8] sm:$0xff] %vm384_vm10, %v383_v25 }

</bundles_post_ra>
